<compile_context>
chip_gen: v6e
topology: v6e:2x2x1
jax: 0.10.0
libtpu: 0.0.40
codegen_flags: <defaults>
</compile_context>

<pallas_src>
import functools

import jax
import jax.numpy as jnp
from jax import lax
from jax.experimental import pallas as pl
from jax.experimental.pallas import tpu as pltpu


def _xwwx_attn_kernel(x_ref, wq_ref, wk_ref, wv_ref, wp_ref,
                      qb_ref, kb_ref, vb_ref, pb_ref,
                      out_ref,
                      k_hsd, v_hsd, q_hsd, ctx_se,
                      *, num_heads, head_dim, block_q, seq_len):
    H, Dh, S, tq = num_heads, head_dim, seq_len, block_q
    qi = pl.program_id(1)
    cdt = wq_ref.dtype                      # matmul compute dtype (bf16)

    # ---- once per batch (q-tile 0): per-head keys (= raw x) and values ----
    @pl.when(qi == 0)
    def _():
        x_all = x_ref[0]                    # (S, E) bf16
        v_all = jnp.dot(x_all, wv_ref[...],
                        preferred_element_type=jnp.float32) + vb_ref[...]
        for h in range(H):                  # static slice copies only (amortized)
            sl = slice(h * Dh, (h + 1) * Dh)
            k_hsd[h, :, :] = x_all[:, sl]
            v_hsd[h, :, :] = v_all[:, sl].astype(v_hsd.dtype)

    # ---- per query tile ----
    q_start = pl.multiple_of(qi * tq, tq)
    x_q = x_ref[0, pl.ds(q_start, tq), :]   # (tq, E) bf16

    q1 = jnp.dot(x_q, wq_ref[...],
                 preferred_element_type=jnp.float32) + qb_ref[...]
    # (x W_q + b_q) @ W_k^T + b_k   (attention scale pre-folded into W_k / b_k)
    q2 = lax.dot_general(q1.astype(cdt), wk_ref[...],
                         (((1,), (1,)), ((), ())),
                         preferred_element_type=jnp.float32) + kb_ref[...]
    for h in range(H):                      # per-head layout via static slices
        q_hsd[h, :, :] = q2[:, h * Dh:(h + 1) * Dh].astype(q_hsd.dtype)

    # scores for all heads in one batched MXU contraction: (H, tq, S)
    scores = jnp.einsum('hqd,hkd->hqk', q_hsd[...], k_hsd[...],
                        preferred_element_type=jnp.float32)

    row = q_start + lax.broadcasted_iota(jnp.int32, (tq, S), 0)
    col = lax.broadcasted_iota(jnp.int32, (tq, S), 1)
    causal = (col <= row)[None, :, :]       # (1, tq, S), broadcast over heads
    scores = jnp.where(causal, scores, jnp.finfo(jnp.float32).min)

    # softmax in f32; the divide goes to the EUP via approx reciprocal
    m = jnp.max(scores, axis=-1, keepdims=True)
    e = jnp.exp(scores - m)
    probs = e * pl.reciprocal(jnp.sum(e, axis=-1, keepdims=True), approx=True)
    # attn_dropout: identity in eval mode

    # context for all heads in one batched MXU contraction: (H, tq, Dh)
    ctx = jnp.einsum('hqk,hkd->hqd', probs.astype(cdt), v_hsd[...],
                     preferred_element_type=jnp.float32)
    for h in range(H):                      # merge heads into a (tq, E) scratch
        ctx_se[:, h * Dh:(h + 1) * Dh] = ctx[h].astype(ctx_se.dtype)

    # c_proj ; resid_dropout is identity in eval mode
    out = jnp.dot(ctx_se[...], wp_ref[...],
                  preferred_element_type=jnp.float32) + pb_ref[...]
    out_ref[0] = out.astype(out_ref.dtype)


def gpt2_xwwx_attention(hidden_states, c_attn_w, c_attn_b, c_proj_w, c_proj_b,
                        *, num_heads, scale_attn_weights=True,
                        scale_attn_by_inverse_layer_idx=False, layer_idx=None,
                        block_q=128, compute_dtype=jnp.bfloat16):
    """hidden_states: (B, S, E) float32. Returns attn_output (B, S, E)."""
    B, S, E = hidden_states.shape
    Dh = E // num_heads
    assert Dh * num_heads == E, "hidden size must be divisible by num_heads"

    tq = min(block_q, S)
    if tq != S:
        assert S % tq == 0 and tq % 8 == 0, "S must be divisible by block_q (mult of 8)"
    n_q = S // tq

    # HF Conv1D split of c_attn weight (E, 3E) / bias (3E,)
    w_q = c_attn_w[:, 0:E]
    w_k = c_attn_w[:, E:2 * E]
    w_v = c_attn_w[:, 2 * E:3 * E]
    q_b = c_attn_b[0:E]
    k_b = c_attn_b[E:2 * E]
    v_b = c_attn_b[2 * E:3 * E]

    scale = 1.0
    if scale_attn_weights:
        scale /= float(Dh) ** 0.5
    if scale_attn_by_inverse_layer_idx:
        scale /= float(layer_idx + 1)

    # fold the attention scale into the W_k projection (zero in-kernel cost)
    w_k = w_k * scale
    k_b = k_b * scale

    f32 = jnp.float32
    x_c = hidden_states.astype(compute_dtype)
    w_q_c, w_k_c, w_v_c, w_p_c = (w.astype(compute_dtype)
                                  for w in (w_q, w_k, w_v, c_proj_w))
    qb2 = q_b.reshape(1, E).astype(f32)
    kb2 = k_b.reshape(1, E).astype(f32)
    vb2 = v_b.reshape(1, E).astype(f32)
    pb2 = c_proj_b.reshape(1, E).astype(f32)

    kernel = functools.partial(_xwwx_attn_kernel, num_heads=num_heads,
                               head_dim=Dh, block_q=tq, seq_len=S)

    const2d = lambda shape: pl.BlockSpec(shape, lambda b, q: (0, 0))

    return pl.pallas_call(
        kernel,
        out_shape=jax.ShapeDtypeStruct((B, S, E), hidden_states.dtype),
        grid_spec=pltpu.PrefetchScalarGridSpec(
            num_scalar_prefetch=0,
            grid=(B, n_q),
            in_specs=[
                pl.BlockSpec((1, S, E), lambda b, q: (b, 0, 0)),  # x, resident per b
                const2d((E, E)),   # w_q
                const2d((E, E)),   # w_k (pre-scaled)
                const2d((E, E)),   # w_v
                const2d((E, E)),   # w_proj
                const2d((1, E)),   # q_bias
                const2d((1, E)),   # k_bias (pre-scaled)
                const2d((1, E)),   # v_bias
                const2d((1, E)),   # proj_bias
            ],
            out_specs=pl.BlockSpec((1, tq, E), lambda b, q: (b, q, 0)),
            scratch_shapes=[
                pltpu.VMEM((num_heads, S, Dh), compute_dtype),   # keys (per head)
                pltpu.VMEM((num_heads, S, Dh), compute_dtype),   # values (per head)
                pltpu.VMEM((num_heads, tq, Dh), compute_dtype),  # q2 (per head)
                pltpu.VMEM((tq, E), compute_dtype),              # merged context
            ]),
        compiler_params=pltpu.CompilerParams(
            dimension_semantics=("parallel", "arbitrary"),
            vmem_limit_bytes=48 * 1024 * 1024),
    )(x_c, w_q_c, w_k_c, w_v_c, w_p_c, qb2, kb2, vb2, pb2)


def _reference(hidden_states, c_attn_w, c_attn_b, c_proj_w, c_proj_b,
               *, num_heads, scale):
    """Pure-JAX f32 reference mirroring the PyTorch _xwwx_attn forward."""
    B, S, E = hidden_states.shape
    Dh = E // num_heads
    w_q, w_k, w_v = c_attn_w[:, :E], c_attn_w[:, E:2 * E], c_attn_w[:, 2 * E:]
    q_b, k_b, v_b = c_attn_b[:E], c_attn_b[E:2 * E], c_attn_b[2 * E:]

    x = hidden_states
    q1 = x @ w_q + q_b
    q2 = q1 @ w_k.T + k_b
    v = x @ w_v + v_b

    qh = q2.reshape(B, S, num_heads, Dh).transpose(0, 2, 1, 3)
    xh = x.reshape(B, S, num_heads, Dh).transpose(0, 2, 1, 3)
    vh = v.reshape(B, S, num_heads, Dh).transpose(0, 2, 1, 3)

    scores = jnp.einsum('bhqd,bhkd->bhqk', qh, xh).astype(jnp.float32) * scale
    causal = jnp.tril(jnp.ones((S, S), dtype=bool))
    scores = jnp.where(causal[None, None], scores, jnp.finfo(jnp.float32).min)
    probs = jax.nn.softmax(scores, axis=-1)
    ctx = jnp.einsum('bhqk,bhkd->bhqd', probs, vh)
    ctx = ctx.transpose(0, 2, 1, 3).reshape(B, S, E)
    return ctx @ c_proj_w + c_proj_b


def _make_inputs(key, B, S, E):
    kx, kw1, kb1, kw2, kb2 = jax.random.split(key, 5)
    hidden_states = jax.random.normal(kx, (B, S, E), dtype=jnp.float32)
    c_attn_w = 0.02 * jax.random.normal(kw1, (E, 3 * E), dtype=jnp.float32)
    c_attn_b = 0.02 * jax.random.normal(kb1, (3 * E,), dtype=jnp.float32)
    c_proj_w = 0.02 * jax.random.normal(kw2, (E, E), dtype=jnp.float32)
    c_proj_b = 0.02 * jax.random.normal(kb2, (E,), dtype=jnp.float32)
    return hidden_states, c_attn_w, c_attn_b, c_proj_w, c_proj_b


if __name__ == "__main__":
    key = jax.random.PRNGKey(0)
    k1, k2 = jax.random.split(key, 2)

    # config 1 (module-scale small shapes): hidden=32, heads=4, seq=8, batch=2
    B, S, E, H = 2, 8, 32, 4
    x, caw, cab, cpw, cpb = _make_inputs(k1, B, S, E)
    out = gpt2_xwwx_attention(x, caw, cab, cpw, cpb, num_heads=H)
    out = jax.block_until_ready(out)
    ref = _reference(x, caw, cab, cpw, cpb, num_heads=H, scale=1.0 / (E // H) ** 0.5)
    assert out.shape == (B, S, E)
    # bf16 MXU path + approx reciprocal -> loosened tolerance vs f32 reference
    assert jnp.allclose(out, ref, atol=2e-2, rtol=2e-2), "mismatch vs reference (cfg1)"

    # config 2: exercises the multi-query-tile path (grid q axis > 1)
    B, S, E, H = 1, 128, 64, 2
    x, caw, cab, cpw, cpb = _make_inputs(k2, B, S, E)
    out = gpt2_xwwx_attention(x, caw, cab, cpw, cpb, num_heads=H, block_q=64)
    out = jax.block_until_ready(out)
    ref = _reference(x, caw, cab, cpw, cpb, num_heads=H, scale=1.0 / (E // H) ** 0.5)
    assert out.shape == (B, S, E)
    assert jnp.allclose(out, ref, atol=2e-2, rtol=2e-2), "mismatch vs reference (cfg2)"

    print("KERNEL_OK")
</pallas_src>

<mosaic_0001>
module attributes {stable_mosaic.version = 11 : i64} {
  func.func @_xwwx_attn_kernel(%arg0: i32, %arg1: i32, %arg2: memref<1x8x32xbf16, #tpu.memory_space<vmem>>, %arg3: memref<32x32xbf16, #tpu.memory_space<vmem>>, %arg4: memref<32x32xbf16, #tpu.memory_space<vmem>>, %arg5: memref<32x32xbf16, #tpu.memory_space<vmem>>, %arg6: memref<32x32xbf16, #tpu.memory_space<vmem>>, %arg7: memref<1x32xf32, #tpu.memory_space<vmem>>, %arg8: memref<1x32xf32, #tpu.memory_space<vmem>>, %arg9: memref<1x32xf32, #tpu.memory_space<vmem>>, %arg10: memref<1x32xf32, #tpu.memory_space<vmem>>, %arg11: memref<1x8x32xf32, #tpu.memory_space<vmem>>, %arg12: memref<4x8x8xbf16, #tpu.memory_space<vmem>>, %arg13: memref<4x8x8xbf16, #tpu.memory_space<vmem>>, %arg14: memref<4x8x8xbf16, #tpu.memory_space<vmem>>, %arg15: memref<8x32xbf16, #tpu.memory_space<vmem>>) attributes {dimension_semantics = [#tpu.dimension_semantics<parallel>, #tpu.dimension_semantics<arbitrary>], iteration_bounds = array<i64: 2, 1>, scalar_prefetch = 0 : i64, scratch_operands = 4 : i64, tpu.core_type = #tpu.core_type<tc>, window_params = [{transform_indices = @transform_0, window_bounds = array<i64: 1, 8, 32>}, {pipeline_mode = #tpu.pipeline_mode<synchronous>, transform_indices = @transform_1, window_bounds = array<i64: 32, 32>}, {pipeline_mode = #tpu.pipeline_mode<synchronous>, transform_indices = @transform_2, window_bounds = array<i64: 32, 32>}, {pipeline_mode = #tpu.pipeline_mode<synchronous>, transform_indices = @transform_3, window_bounds = array<i64: 32, 32>}, {pipeline_mode = #tpu.pipeline_mode<synchronous>, transform_indices = @transform_4, window_bounds = array<i64: 32, 32>}, {pipeline_mode = #tpu.pipeline_mode<synchronous>, transform_indices = @transform_5, window_bounds = array<i64: 1, 32>}, {pipeline_mode = #tpu.pipeline_mode<synchronous>, transform_indices = @transform_6, window_bounds = array<i64: 1, 32>}, {pipeline_mode = #tpu.pipeline_mode<synchronous>, transform_indices = @transform_7, window_bounds = array<i64: 1, 32>}, {pipeline_mode = #tpu.pipeline_mode<synchronous>, transform_indices = @transform_8, window_bounds = array<i64: 1, 32>}, {transform_indices = @transform_9, window_bounds = array<i64: 1, 8, 32>}]} {
    %c0_i32 = arith.constant 0 : i32
    %0 = arith.cmpi eq, %arg1, %c0_i32 : i32
    %1 = arith.extui %0 : i1 to i32
    %c0_i32_0 = arith.constant 0 : i32
    %2 = arith.cmpi ne, %1, %c0_i32_0 : i32
    scf.if %2 {
      %c0_49 = arith.constant 0 : index
      %c0_50 = arith.constant 0 : index
      %c0_51 = arith.constant 0 : index
      %90 = vector.load %arg2[%c0_49, %c0_50, %c0_51] : memref<1x8x32xbf16, #tpu.memory_space<vmem>>, vector<1x8x32xbf16>
      %91 = vector.shape_cast %90 : vector<1x8x32xbf16> to vector<8x32xbf16>
      %c0_52 = arith.constant 0 : index
      %c0_53 = arith.constant 0 : index
      %92 = vector.load %arg5[%c0_52, %c0_53] : memref<32x32xbf16, #tpu.memory_space<vmem>>, vector<32x32xbf16>
      %cst_54 = arith.constant dense<0.000000e+00> : vector<8x32xf32>
      %93 = tpu.matmul %91, %92, %cst_54 {dimension_numbers = #tpu.dot_dimension_numbers<[1], [0], [0], [1], [0, 0, 1, 1], [], []>} : vector<8x32xbf16>, vector<32x32xbf16>, vector<8x32xf32> -> vector<8x32xf32>
      %c0_55 = arith.constant 0 : index
      %c0_56 = arith.constant 0 : index
      %94 = vector.load %arg9[%c0_55, %c0_56] : memref<1x32xf32, #tpu.memory_space<vmem>>, vector<1x32xf32>
      %95 = vector.broadcast %94 : vector<1x32xf32> to vector<8x32xf32>
      %96 = arith.addf %93, %95 : vector<8x32xf32>
      %97 = vector.extract_strided_slice %91 {offsets = [0, 0], sizes = [8, 8], strides = [1, 1]} : vector<8x32xbf16> to vector<8x8xbf16>
      %c0_57 = arith.constant 0 : index
      %c0_58 = arith.constant 0 : index
      %c0_59 = arith.constant 0 : index
      %98 = vector.load %arg12[%c0_57, %c0_58, %c0_59] : memref<4x8x8xbf16, #tpu.memory_space<vmem>>, vector<1x8x8xbf16>
      %99 = vector.shape_cast %98 : vector<1x8x8xbf16> to vector<8x8xbf16>
      %100 = vector.shape_cast %97 : vector<8x8xbf16> to vector<1x8x8xbf16>
      tpu.vector_store %arg12[%c0_57, %c0_58, %c0_59], %100 {strides = array<i32>} : memref<4x8x8xbf16, #tpu.memory_space<vmem>>, vector<1x8x8xbf16>,
      %101 = vector.extract_strided_slice %96 {offsets = [0, 0], sizes = [8, 8], strides = [1, 1]} : vector<8x32xf32> to vector<8x8xf32>
      %102 = arith.truncf %101 : vector<8x8xf32> to vector<8x8xbf16>
      %c0_60 = arith.constant 0 : index
      %c0_61 = arith.constant 0 : index
      %c0_62 = arith.constant 0 : index
      %103 = vector.load %arg13[%c0_60, %c0_61, %c0_62] : memref<4x8x8xbf16, #tpu.memory_space<vmem>>, vector<1x8x8xbf16>
      %104 = vector.shape_cast %103 : vector<1x8x8xbf16> to vector<8x8xbf16>
      %105 = vector.shape_cast %102 : vector<8x8xbf16> to vector<1x8x8xbf16>
      tpu.vector_store %arg13[%c0_60, %c0_61, %c0_62], %105 {strides = array<i32>} : memref<4x8x8xbf16, #tpu.memory_space<vmem>>, vector<1x8x8xbf16>,
      %106 = vector.extract_strided_slice %91 {offsets = [0, 8], sizes = [8, 8], strides = [1, 1]} : vector<8x32xbf16> to vector<8x8xbf16>
      %c1_63 = arith.constant 1 : index
      %c0_64 = arith.constant 0 : index
      %c0_65 = arith.constant 0 : index
      %107 = vector.load %arg12[%c1_63, %c0_64, %c0_65] : memref<4x8x8xbf16, #tpu.memory_space<vmem>>, vector<1x8x8xbf16>
      %108 = vector.shape_cast %107 : vector<1x8x8xbf16> to vector<8x8xbf16>
      %109 = vector.shape_cast %106 : vector<8x8xbf16> to vector<1x8x8xbf16>
      tpu.vector_store %arg12[%c1_63, %c0_64, %c0_65], %109 {strides = array<i32>} : memref<4x8x8xbf16, #tpu.memory_space<vmem>>, vector<1x8x8xbf16>,
      %110 = vector.extract_strided_slice %96 {offsets = [0, 8], sizes = [8, 8], strides = [1, 1]} : vector<8x32xf32> to vector<8x8xf32>
      %111 = arith.truncf %110 : vector<8x8xf32> to vector<8x8xbf16>
      %c1_66 = arith.constant 1 : index
      %c0_67 = arith.constant 0 : index
      %c0_68 = arith.constant 0 : index
      %112 = vector.load %arg13[%c1_66, %c0_67, %c0_68] : memref<4x8x8xbf16, #tpu.memory_space<vmem>>, vector<1x8x8xbf16>
      %113 = vector.shape_cast %112 : vector<1x8x8xbf16> to vector<8x8xbf16>
      %114 = vector.shape_cast %111 : vector<8x8xbf16> to vector<1x8x8xbf16>
      tpu.vector_store %arg13[%c1_66, %c0_67, %c0_68], %114 {strides = array<i32>} : memref<4x8x8xbf16, #tpu.memory_space<vmem>>, vector<1x8x8xbf16>,
      %115 = vector.extract_strided_slice %91 {offsets = [0, 16], sizes = [8, 8], strides = [1, 1]} : vector<8x32xbf16> to vector<8x8xbf16>
      %c2_69 = arith.constant 2 : index
      %c0_70 = arith.constant 0 : index
      %c0_71 = arith.constant 0 : index
      %116 = vector.load %arg12[%c2_69, %c0_70, %c0_71] : memref<4x8x8xbf16, #tpu.memory_space<vmem>>, vector<1x8x8xbf16>
      %117 = vector.shape_cast %116 : vector<1x8x8xbf16> to vector<8x8xbf16>
      %118 = vector.shape_cast %115 : vector<8x8xbf16> to vector<1x8x8xbf16>
      tpu.vector_store %arg12[%c2_69, %c0_70, %c0_71], %118 {strides = array<i32>} : memref<4x8x8xbf16, #tpu.memory_space<vmem>>, vector<1x8x8xbf16>,
      %119 = vector.extract_strided_slice %96 {offsets = [0, 16], sizes = [8, 8], strides = [1, 1]} : vector<8x32xf32> to vector<8x8xf32>
      %120 = arith.truncf %119 : vector<8x8xf32> to vector<8x8xbf16>
      %c2_72 = arith.constant 2 : index
      %c0_73 = arith.constant 0 : index
      %c0_74 = arith.constant 0 : index
      %121 = vector.load %arg13[%c2_72, %c0_73, %c0_74] : memref<4x8x8xbf16, #tpu.memory_space<vmem>>, vector<1x8x8xbf16>
      %122 = vector.shape_cast %121 : vector<1x8x8xbf16> to vector<8x8xbf16>
      %123 = vector.shape_cast %120 : vector<8x8xbf16> to vector<1x8x8xbf16>
      tpu.vector_store %arg13[%c2_72, %c0_73, %c0_74], %123 {strides = array<i32>} : memref<4x8x8xbf16, #tpu.memory_space<vmem>>, vector<1x8x8xbf16>,
      %124 = vector.extract_strided_slice %91 {offsets = [0, 24], sizes = [8, 8], strides = [1, 1]} : vector<8x32xbf16> to vector<8x8xbf16>
      %c3_75 = arith.constant 3 : index
      %c0_76 = arith.constant 0 : index
      %c0_77 = arith.constant 0 : index
      %125 = vector.load %arg12[%c3_75, %c0_76, %c0_77] : memref<4x8x8xbf16, #tpu.memory_space<vmem>>, vector<1x8x8xbf16>
      %126 = vector.shape_cast %125 : vector<1x8x8xbf16> to vector<8x8xbf16>
      %127 = vector.shape_cast %124 : vector<8x8xbf16> to vector<1x8x8xbf16>
      tpu.vector_store %arg12[%c3_75, %c0_76, %c0_77], %127 {strides = array<i32>} : memref<4x8x8xbf16, #tpu.memory_space<vmem>>, vector<1x8x8xbf16>,
      %128 = vector.extract_strided_slice %96 {offsets = [0, 24], sizes = [8, 8], strides = [1, 1]} : vector<8x32xf32> to vector<8x8xf32>
      %129 = arith.truncf %128 : vector<8x8xf32> to vector<8x8xbf16>
      %c3_78 = arith.constant 3 : index
      %c0_79 = arith.constant 0 : index
      %c0_80 = arith.constant 0 : index
      %130 = vector.load %arg13[%c3_78, %c0_79, %c0_80] : memref<4x8x8xbf16, #tpu.memory_space<vmem>>, vector<1x8x8xbf16>
      %131 = vector.shape_cast %130 : vector<1x8x8xbf16> to vector<8x8xbf16>
      %132 = vector.shape_cast %129 : vector<8x8xbf16> to vector<1x8x8xbf16>
      tpu.vector_store %arg13[%c3_78, %c0_79, %c0_80], %132 {strides = array<i32>} : memref<4x8x8xbf16, #tpu.memory_space<vmem>>, vector<1x8x8xbf16>,
    } else {
    }
    %c8_i32 = arith.constant 8 : i32
    %3 = arith.muli %arg1, %c8_i32 : i32
    %4 = tpu.assume_multiple %3, 8 : i32
    %c0 = arith.constant 0 : index
    %5 = arith.index_cast %4 : i32 to index
    %c0_1 = arith.constant 0 : index
    %6 = vector.load %arg2[%c0, %5, %c0_1] : memref<1x8x32xbf16, #tpu.memory_space<vmem>>, vector<1x8x32xbf16>
    %7 = vector.shape_cast %6 : vector<1x8x32xbf16> to vector<8x32xbf16>
    %c0_2 = arith.constant 0 : index
    %c0_3 = arith.constant 0 : index
    %8 = vector.load %arg3[%c0_2, %c0_3] : memref<32x32xbf16, #tpu.memory_space<vmem>>, vector<32x32xbf16>
    %cst = arith.constant dense<0.000000e+00> : vector<8x32xf32>
    %9 = tpu.matmul %7, %8, %cst {dimension_numbers = #tpu.dot_dimension_numbers<[1], [0], [0], [1], [0, 0, 1, 1], [], []>} : vector<8x32xbf16>, vector<32x32xbf16>, vector<8x32xf32> -> vector<8x32xf32>
    %c0_4 = arith.constant 0 : index
    %c0_5 = arith.constant 0 : index
    %10 = vector.load %arg7[%c0_4, %c0_5] : memref<1x32xf32, #tpu.memory_space<vmem>>, vector<1x32xf32>
    %11 = vector.broadcast %10 : vector<1x32xf32> to vector<8x32xf32>
    %12 = arith.addf %9, %11 : vector<8x32xf32>
    %13 = arith.truncf %12 : vector<8x32xf32> to vector<8x32xbf16>
    %c0_6 = arith.constant 0 : index
    %c0_7 = arith.constant 0 : index
    %14 = vector.load %arg4[%c0_6, %c0_7] : memref<32x32xbf16, #tpu.memory_space<vmem>>, vector<32x32xbf16>
    %cst_8 = arith.constant dense<0.000000e+00> : vector<8x32xf32>
    %15 = tpu.matmul %13, %14, %cst_8 {dimension_numbers = #tpu.dot_dimension_numbers<[1], [1], [0], [0], [0, 0, 1, 0], [], []>} : vector<8x32xbf16>, vector<32x32xbf16>, vector<8x32xf32> -> vector<8x32xf32>
    %c0_9 = arith.constant 0 : index
    %c0_10 = arith.constant 0 : index
    %16 = vector.load %arg8[%c0_9, %c0_10] : memref<1x32xf32, #tpu.memory_space<vmem>>, vector<1x32xf32>
    %17 = vector.broadcast %16 : vector<1x32xf32> to vector<8x32xf32>
    %18 = arith.addf %15, %17 : vector<8x32xf32>
    %19 = vector.extract_strided_slice %18 {offsets = [0, 0], sizes = [8, 8], strides = [1, 1]} : vector<8x32xf32> to vector<8x8xf32>
    %20 = arith.truncf %19 : vector<8x8xf32> to vector<8x8xbf16>
    %c0_11 = arith.constant 0 : index
    %c0_12 = arith.constant 0 : index
    %c0_13 = arith.constant 0 : index
    %21 = vector.load %arg14[%c0_11, %c0_12, %c0_13] : memref<4x8x8xbf16, #tpu.memory_space<vmem>>, vector<1x8x8xbf16>
    %22 = vector.shape_cast %21 : vector<1x8x8xbf16> to vector<8x8xbf16>
    %23 = vector.shape_cast %20 : vector<8x8xbf16> to vector<1x8x8xbf16>
    tpu.vector_store %arg14[%c0_11, %c0_12, %c0_13], %23 {strides = array<i32>} : memref<4x8x8xbf16, #tpu.memory_space<vmem>>, vector<1x8x8xbf16>,
    %24 = vector.extract_strided_slice %18 {offsets = [0, 8], sizes = [8, 8], strides = [1, 1]} : vector<8x32xf32> to vector<8x8xf32>
    %25 = arith.truncf %24 : vector<8x8xf32> to vector<8x8xbf16>
    %c1 = arith.constant 1 : index
    %c0_14 = arith.constant 0 : index
    %c0_15 = arith.constant 0 : index
    %26 = vector.load %arg14[%c1, %c0_14, %c0_15] : memref<4x8x8xbf16, #tpu.memory_space<vmem>>, vector<1x8x8xbf16>
    %27 = vector.shape_cast %26 : vector<1x8x8xbf16> to vector<8x8xbf16>
    %28 = vector.shape_cast %25 : vector<8x8xbf16> to vector<1x8x8xbf16>
    tpu.vector_store %arg14[%c1, %c0_14, %c0_15], %28 {strides = array<i32>} : memref<4x8x8xbf16, #tpu.memory_space<vmem>>, vector<1x8x8xbf16>,
    %29 = vector.extract_strided_slice %18 {offsets = [0, 16], sizes = [8, 8], strides = [1, 1]} : vector<8x32xf32> to vector<8x8xf32>
    %30 = arith.truncf %29 : vector<8x8xf32> to vector<8x8xbf16>
    %c2 = arith.constant 2 : index
    %c0_16 = arith.constant 0 : index
    %c0_17 = arith.constant 0 : index
    %31 = vector.load %arg14[%c2, %c0_16, %c0_17] : memref<4x8x8xbf16, #tpu.memory_space<vmem>>, vector<1x8x8xbf16>
    %32 = vector.shape_cast %31 : vector<1x8x8xbf16> to vector<8x8xbf16>
    %33 = vector.shape_cast %30 : vector<8x8xbf16> to vector<1x8x8xbf16>
    tpu.vector_store %arg14[%c2, %c0_16, %c0_17], %33 {strides = array<i32>} : memref<4x8x8xbf16, #tpu.memory_space<vmem>>, vector<1x8x8xbf16>,
    %34 = vector.extract_strided_slice %18 {offsets = [0, 24], sizes = [8, 8], strides = [1, 1]} : vector<8x32xf32> to vector<8x8xf32>
    %35 = arith.truncf %34 : vector<8x8xf32> to vector<8x8xbf16>
    %c3 = arith.constant 3 : index
    %c0_18 = arith.constant 0 : index
    %c0_19 = arith.constant 0 : index
    %36 = vector.load %arg14[%c3, %c0_18, %c0_19] : memref<4x8x8xbf16, #tpu.memory_space<vmem>>, vector<1x8x8xbf16>
    %37 = vector.shape_cast %36 : vector<1x8x8xbf16> to vector<8x8xbf16>
    %38 = vector.shape_cast %35 : vector<8x8xbf16> to vector<1x8x8xbf16>
    tpu.vector_store %arg14[%c3, %c0_18, %c0_19], %38 {strides = array<i32>} : memref<4x8x8xbf16, #tpu.memory_space<vmem>>, vector<1x8x8xbf16>,
    %c0_20 = arith.constant 0 : index
    %c0_21 = arith.constant 0 : index
    %c0_22 = arith.constant 0 : index
    %39 = vector.load %arg14[%c0_20, %c0_21, %c0_22] : memref<4x8x8xbf16, #tpu.memory_space<vmem>>, vector<4x8x8xbf16>
    %c0_23 = arith.constant 0 : index
    %c0_24 = arith.constant 0 : index
    %c0_25 = arith.constant 0 : index
    %40 = vector.load %arg12[%c0_23, %c0_24, %c0_25] : memref<4x8x8xbf16, #tpu.memory_space<vmem>>, vector<4x8x8xbf16>
    "tpu.trace_start"() <{level = 10 : i32, message = "hqd,hkd->hqk"}> : () -> ()
    %cst_26 = arith.constant dense<0.000000e+00> : vector<4x8x8xf32>
    %41 = tpu.matmul %39, %40, %cst_26 {dimension_numbers = #tpu.dot_dimension_numbers<[2], [2], [1], [1], [0, 0, 0, 1, 1, 1], [0], [0]>} : vector<4x8x8xbf16>, vector<4x8x8xbf16>, vector<4x8x8xf32> -> vector<4x8x8xf32>
    "tpu.trace_stop"() : () -> ()
    %42 = tpu.iota {dimensions = array<i32: 0>} : vector<8x8xi32>
    %43 = vector.broadcast %4 : i32 to vector<8x8xi32>
    %44 = arith.addi %43, %42 : vector<8x8xi32>
    %45 = tpu.iota {dimensions = array<i32: 1>} : vector<8x8xi32>
    %46 = arith.cmpi sle, %45, %44 : vector<8x8xi32>
    %47 = vector.shape_cast %46 : vector<8x8xi1> to vector<1x8x8xi1>
    %cst_27 = arith.constant -3.40282347E+38 : f32
    %48 = vector.shape_cast %47 : vector<1x8x8xi1> to vector<1x8x8xi1>
    %49 = vector.broadcast %48 : vector<1x8x8xi1> to vector<4x8x8xi1>
    %50 = vector.broadcast %cst_27 : f32 to vector<4x8x8xf32>
    %51 = arith.select %49, %41, %50 : vector<4x8x8xi1>, vector<4x8x8xf32>
    %cst_28 = arith.constant dense<0xFF800000> : vector<4x8xf32>
    %52 = vector.multi_reduction <maximumf>, %51, %cst_28 [2] : vector<4x8x8xf32> to vector<4x8xf32>
    %53 = vector.shape_cast %52 : vector<4x8xf32> to vector<4x8x1xf32>
    %54 = vector.broadcast %53 : vector<4x8x1xf32> to vector<4x8x8xf32>
    %55 = arith.subf %51, %54 : vector<4x8x8xf32>
    %56 = math.exp %55 : vector<4x8x8xf32>
    %cst_29 = arith.constant dense<0.000000e+00> : vector<4x8xf32>
    %57 = vector.multi_reduction <add>, %56, %cst_29 [2] : vector<4x8x8xf32> to vector<4x8xf32>
    %58 = vector.shape_cast %57 : vector<4x8xf32> to vector<4x8x1xf32>
    %59 = tpu.reciprocal %58 {approx = true} : vector<4x8x1xf32> -> vector<4x8x1xf32>
    %60 = vector.broadcast %59 : vector<4x8x1xf32> to vector<4x8x8xf32>
    %61 = arith.mulf %56, %60 : vector<4x8x8xf32>
    %62 = arith.truncf %61 : vector<4x8x8xf32> to vector<4x8x8xbf16>
    %c0_30 = arith.constant 0 : index
    %c0_31 = arith.constant 0 : index
    %c0_32 = arith.constant 0 : index
    %63 = vector.load %arg13[%c0_30, %c0_31, %c0_32] : memref<4x8x8xbf16, #tpu.memory_space<vmem>>, vector<4x8x8xbf16>
    "tpu.trace_start"() <{level = 10 : i32, message = "hqk,hkd->hqd"}> : () -> ()
    %cst_33 = arith.constant dense<0.000000e+00> : vector<4x8x8xf32>
    %64 = tpu.matmul %62, %63, %cst_33 {dimension_numbers = #tpu.dot_dimension_numbers<[2], [1], [1], [2], [0, 0, 0, 1, 1, 2], [0], [0]>} : vector<4x8x8xbf16>, vector<4x8x8xbf16>, vector<4x8x8xf32> -> vector<4x8x8xf32>
    "tpu.trace_stop"() : () -> ()
    %65 = vector.extract_strided_slice %64 {offsets = [0, 0, 0], sizes = [1, 8, 8], strides = [1, 1, 1]} : vector<4x8x8xf32> to vector<1x8x8xf32>
    %66 = vector.shape_cast %65 : vector<1x8x8xf32> to vector<8x8xf32>
    %67 = arith.truncf %66 : vector<8x8xf32> to vector<8x8xbf16>
    %c0_34 = arith.constant 0 : index
    %c0_35 = arith.constant 0 : index
    %68 = vector.load %arg15[%c0_34, %c0_35] : memref<8x32xbf16, #tpu.memory_space<vmem>>, vector<8x8xbf16>
    tpu.vector_store %arg15[%c0_34, %c0_35], %67 {strides = array<i32>} : memref<8x32xbf16, #tpu.memory_space<vmem>>, vector<8x8xbf16>,
    %69 = vector.extract_strided_slice %64 {offsets = [1, 0, 0], sizes = [1, 8, 8], strides = [1, 1, 1]} : vector<4x8x8xf32> to vector<1x8x8xf32>
    %70 = vector.shape_cast %69 : vector<1x8x8xf32> to vector<8x8xf32>
    %71 = arith.truncf %70 : vector<8x8xf32> to vector<8x8xbf16>
    %c0_36 = arith.constant 0 : index
    %c8 = arith.constant 8 : index
    %72 = vector.load %arg15[%c0_36, %c8] : memref<8x32xbf16, #tpu.memory_space<vmem>>, vector<8x8xbf16>
    tpu.vector_store %arg15[%c0_36, %c8], %71 {strides = array<i32>} : memref<8x32xbf16, #tpu.memory_space<vmem>>, vector<8x8xbf16>,
    %73 = vector.extract_strided_slice %64 {offsets = [2, 0, 0], sizes = [1, 8, 8], strides = [1, 1, 1]} : vector<4x8x8xf32> to vector<1x8x8xf32>
    %74 = vector.shape_cast %73 : vector<1x8x8xf32> to vector<8x8xf32>
    %75 = arith.truncf %74 : vector<8x8xf32> to vector<8x8xbf16>
    %c0_37 = arith.constant 0 : index
    %c16 = arith.constant 16 : index
    %76 = vector.load %arg15[%c0_37, %c16] : memref<8x32xbf16, #tpu.memory_space<vmem>>, vector<8x8xbf16>
    tpu.vector_store %arg15[%c0_37, %c16], %75 {strides = array<i32>} : memref<8x32xbf16, #tpu.memory_space<vmem>>, vector<8x8xbf16>,
    %77 = vector.extract_strided_slice %64 {offsets = [3, 0, 0], sizes = [1, 8, 8], strides = [1, 1, 1]} : vector<4x8x8xf32> to vector<1x8x8xf32>
    %78 = vector.shape_cast %77 : vector<1x8x8xf32> to vector<8x8xf32>
    %79 = arith.truncf %78 : vector<8x8xf32> to vector<8x8xbf16>
    %c0_38 = arith.constant 0 : index
    %c24 = arith.constant 24 : index
    %80 = vector.load %arg15[%c0_38, %c24] : memref<8x32xbf16, #tpu.memory_space<vmem>>, vector<8x8xbf16>
    tpu.vector_store %arg15[%c0_38, %c24], %79 {strides = array<i32>} : memref<8x32xbf16, #tpu.memory_space<vmem>>, vector<8x8xbf16>,
    %c0_39 = arith.constant 0 : index
    %c0_40 = arith.constant 0 : index
    %81 = vector.load %arg15[%c0_39, %c0_40] : memref<8x32xbf16, #tpu.memory_space<vmem>>, vector<8x32xbf16>
    %c0_41 = arith.constant 0 : index
    %c0_42 = arith.constant 0 : index
    %82 = vector.load %arg6[%c0_41, %c0_42] : memref<32x32xbf16, #tpu.memory_space<vmem>>, vector<32x32xbf16>
    %cst_43 = arith.constant dense<0.000000e+00> : vector<8x32xf32>
    %83 = tpu.matmul %81, %82, %cst_43 {dimension_numbers = #tpu.dot_dimension_numbers<[1], [0], [0], [1], [0, 0, 1, 1], [], []>} : vector<8x32xbf16>, vector<32x32xbf16>, vector<8x32xf32> -> vector<8x32xf32>
    %c0_44 = arith.constant 0 : index
    %c0_45 = arith.constant 0 : index
    %84 = vector.load %arg10[%c0_44, %c0_45] : memref<1x32xf32, #tpu.memory_space<vmem>>, vector<1x32xf32>
    %85 = vector.broadcast %84 : vector<1x32xf32> to vector<8x32xf32>
    %86 = arith.addf %83, %85 : vector<8x32xf32>
    %c0_46 = arith.constant 0 : index
    %c0_47 = arith.constant 0 : index
    %c0_48 = arith.constant 0 : index
    %87 = vector.load %arg11[%c0_46, %c0_47, %c0_48] : memref<1x8x32xf32, #tpu.memory_space<vmem>>, vector<1x8x32xf32>
    %88 = vector.shape_cast %87 : vector<1x8x32xf32> to vector<8x32xf32>
    %89 = vector.shape_cast %86 : vector<8x32xf32> to vector<1x8x32xf32>
    tpu.vector_store %arg11[%c0_46, %c0_47, %c0_48], %89 {strides = array<i32>} : memref<1x8x32xf32, #tpu.memory_space<vmem>>, vector<1x8x32xf32>,
    return
  }
  func.func @transform_0(%arg0: i32, %arg1: i32) -> (i32, i32, i32) {
    %c0_i32 = arith.constant 0 : i32
    %c0_i32_0 = arith.constant 0 : i32
    %c0_i32_1 = arith.constant 0 : i32
    return %arg0, %c0_i32, %c0_i32_0 : i32, i32, i32
  }
  func.func @transform_1(%arg0: i32, %arg1: i32) -> (i32, i32) {
    %c0_i32 = arith.constant 0 : i32
    %c0_i32_0 = arith.constant 0 : i32
    %c0_i32_1 = arith.constant 0 : i32
    return %c0_i32, %c0_i32_0 : i32, i32
  }
  func.func @transform_2(%arg0: i32, %arg1: i32) -> (i32, i32) {
    %c0_i32 = arith.constant 0 : i32
    %c0_i32_0 = arith.constant 0 : i32
    %c0_i32_1 = arith.constant 0 : i32
    return %c0_i32, %c0_i32_0 : i32, i32
  }
  func.func @transform_3(%arg0: i32, %arg1: i32) -> (i32, i32) {
    %c0_i32 = arith.constant 0 : i32
    %c0_i32_0 = arith.constant 0 : i32
    %c0_i32_1 = arith.constant 0 : i32
    return %c0_i32, %c0_i32_0 : i32, i32
  }
  func.func @transform_4(%arg0: i32, %arg1: i32) -> (i32, i32) {
    %c0_i32 = arith.constant 0 : i32
    %c0_i32_0 = arith.constant 0 : i32
    %c0_i32_1 = arith.constant 0 : i32
    return %c0_i32, %c0_i32_0 : i32, i32
  }
  func.func @transform_5(%arg0: i32, %arg1: i32) -> (i32, i32) {
    %c0_i32 = arith.constant 0 : i32
    %c0_i32_0 = arith.constant 0 : i32
    %c0_i32_1 = arith.constant 0 : i32
    return %c0_i32, %c0_i32_0 : i32, i32
  }
  func.func @transform_6(%arg0: i32, %arg1: i32) -> (i32, i32) {
    %c0_i32 = arith.constant 0 : i32
    %c0_i32_0 = arith.constant 0 : i32
    %c0_i32_1 = arith.constant 0 : i32
    return %c0_i32, %c0_i32_0 : i32, i32
  }
  func.func @transform_7(%arg0: i32, %arg1: i32) -> (i32, i32) {
    %c0_i32 = arith.constant 0 : i32
    %c0_i32_0 = arith.constant 0 : i32
    %c0_i32_1 = arith.constant 0 : i32
    return %c0_i32, %c0_i32_0 : i32, i32
  }
  func.func @transform_8(%arg0: i32, %arg1: i32) -> (i32, i32) {
    %c0_i32 = arith.constant 0 : i32
    %c0_i32_0 = arith.constant 0 : i32
    %c0_i32_1 = arith.constant 0 : i32
    return %c0_i32, %c0_i32_0 : i32, i32
  }
  func.func @transform_9(%arg0: i32, %arg1: i32) -> (i32, i32, i32) {
    %c0_i32 = arith.constant 0 : i32
    %c0_i32_0 = arith.constant 0 : i32
    return %arg0, %arg1, %c0_i32 : i32, i32, i32
  }
}

</mosaic_0001>

<bundles_post_ra>
// kernel: tpu_custom_call.1
= control target key start
LH: loop header
LB: loop body
LE: loop exit
PB: predicated region body
PF: predicated region fallthrough
CT: control target
= control target key end

     0   :  { %s2294_s0 = inlined_call_operand.hbm [shape: bf16[2,8,32], index: 0, kind: input, shape index: {}]   ;;  %s2295_s1 = inlined_call_operand.hbm [shape: bf16[32,32], index: 1, kind: input, shape index: {}]   ;;  %s2296_s2 = inlined_call_operand.hbm [shape: bf16[32,32], index: 2, kind: input, shape index: {}]   ;;  %s2297_s3 = inlined_call_operand.hbm [shape: bf16[32,32], index: 3, kind: input, shape index: {}]   ;;  %s2298_s4 = inlined_call_operand.hbm [shape: bf16[32,32], index: 4, kind: input, shape index: {}]   ;;  %s2299_s5 = inlined_call_operand.vmem [shape: f32[1,32], index: 5, kind: input, shape index: {}]   ;;  %s2300_s6 = inlined_call_operand.vmem [shape: f32[1,32], index: 6, kind: input, shape index: {}]   ;;  %s2301_s7 = inlined_call_operand.vmem [shape: f32[1,32], index: 7, kind: input, shape index: {}]   ;;  %s2302_s8 = inlined_call_operand.vmem [shape: f32[1,32], index: 8, kind: input, shape index: {}]   ;;  %s2303_s9 = inlined_call_operand.hbm [shape: f32[2,8,32], index: 9, kind: output, shape index: {}]  }
   0x1   :  { %2306 = sst [smem:[#allocation22_spill]] %s2295_s1 }
   0x2   :  { %2307 = sst [smem:[#allocation23_spill]] %s2296_s2 }
   0x3   :  { %2308 = sst [smem:[#allocation24_spill]] %s2297_s3 }
   0x4   :  { %2309 = sst [smem:[#allocation25_spill]] %s2298_s4 }
   0x5   :  { %14 = vsyncpa [#allocation7], 0 }
   0x6   :  { %16 = vsyncpa [#allocation7 + $0x1], 0 }
   0x7   :  { %17 = vsyncpa [#allocation10], 0 }
   0x8   :  { %18 = vsyncpa [#allocation13], 0 }
   0x9   :  { %19 = vsyncpa [#allocation8], 0 }
   0xa   :  { %21 = vsyncpa [#allocation8 + $0x1], 0  ;;  %s1958_s30 = smov 0   ;;  %s1960_s10 = smov 0  }
   0xb   :  { %s1962_s11 = smov 0   ;;  %s1964_s12 = smov 0  }
   0xc   :  { %s1966_s13 = smov 0   ;;  %s1968_s14 = smov 0  }
   0xd LB: > { %2310 = sst [smem:[#allocation20_spill]] %s1886_s13  ;;  %s1370_s15 = sadd.s32 4294967295, %s1890_s14   ;;  %s1890_s14 = sphi %s1968_s14, %s27_s14   ;;  %s1886_s13 = sphi %s1966_s13, %s2327_s13   ;;  %s1882_s12 = sphi %s1964_s12, %s2326_s12   ;;  %s1878_s11 = sphi %s1962_s11, %s2330_s11   ;;  %s1874_s10 = sphi %s1960_s10, %s2329_s10   ;;  %s1870_s30 = sphi %s1958_s30, %s2328_s30  }
   0xe   : > { %p1372_p0 = scmp.ge.s32.totalorder %s1890_s14, 1  ;;  %p1992_p1 = scmp.eq.s32.totalorder %s1370_s15, 0 }
   0xf   : > { %p266_p2 = scmp.lt.s32.totalorder %s1890_s14, 3  ;;  %s1892_s18 = smov [#allocation9]  }
  0x10   : > { %s278_s19 = sshll.u32 %s1892_s18, 4  ;;  %s1893_s21 = smov [#allocation12]   ;;  %s279_s19 = int_to_ptr.vmem [resolvable:$true] %s278_s19 }
  0x11   : > { %p1997_p3 = pnand %p1372_p0, %p266_p2  ;;  %s304_s22 = sshll.u32 %s1893_s21, 4  ;;  %s305_s22 = int_to_ptr.vmem [resolvable:$true] %s304_s22 }
  0x12   : > { %s1894_s23 = smov [#allocation11]   ;;  %s1681_s25 = scalar_lea.vmem %s279_s19, 256 }
  0x13   : > { %p1553_p4 = pneg %p1997_p3  ;;  %s291_s24 = sshll.u32 %s1894_s23, 4  ;;  %s292_s24 = int_to_ptr.vmem [resolvable:$true] %s291_s24 }
  0x14   : > { %p1682_p8 = scmp.ne.s32.totalorder %s279_s19, %s1681_s25  ;;  %p1689_p11 = scmp.lt.s32.totalorder %s279_s19, %s279_s19 }
  0x15   : > { %p2006_p6 = pnand %p1553_p4, %p1992_p1  ;;  %p1690_p12 = scmp.lt.s32.totalorder %s1681_s25, %s1681_s25 }
  0x17   : > { %p1672_p7 = pneg %p2006_p6  ;;  %p1691_p13 = por %p1690_p12, %p1689_p11 }
  0x19   : > { %p1684_p9 = pnand %p1682_p8, %p1672_p7 }
  0x1b   : > { %p1685_p10 = pneg %p1684_p9 }
  0x1d   : > { %p1692_p0 = pnand %p1691_p13, %p1685_p10 }
  0x1f   : > { %1695 = shalt.err (!%p1692_p0)
}
  0x20   : > { %s1895_s26 = smov 64   ;;  %s1896_s27 = smov 4  }
  0x21   : > { %s2314_s1 = sld [smem:[#allocation22_spill]]  ;;  %s1707_s18 = scalar_lea.vmem %s305_s22, 256 }
  0x22   : > { %p1708_p2 = scmp.ne.s32.totalorder %s305_s22, %s1707_s18  ;;  %p1715_p9 = scmp.lt.s32.totalorder %s305_s22, %s305_s22 }
  0x23   : > { %p1716_p10 = scmp.lt.s32.totalorder %s1707_s18, %s1707_s18 }
  0x24   : > { %p1710_p4 = pnand %p1708_p2, %p1672_p7 }
  0x25   : > { %p1717_p11 = por %p1716_p10, %p1715_p9 }
  0x26   : > { %p1711_p8 = pneg %p1710_p4 }
  0x27   : > { %1556 = dma.hbm_to_vmem [thread:$0]  (!%p2006_p6), %s2314_s1, 256, %s279_s19, [#allocation10], %s1895_s26, %s1895_s26, %s1896_s27  }
  0x28   : > { %p1718_p12 = pnand %p1717_p11, %p1711_p8 }
  0x2a   : > { %1721 = shalt.err (!%p1718_p12)
}
  0x2b   : > { %s2315_s3 = sld [smem:[#allocation24_spill]]  ;;  %s1733_s19 = scalar_lea.vmem %s292_s24, 256 }
  0x2c   : > { %p1734_p13 = scmp.ne.s32.totalorder %s292_s24, %s1733_s19  ;;  %p1741_p4 = scmp.lt.s32.totalorder %s292_s24, %s292_s24 }
  0x2d   : > { %p1742_p8 = scmp.lt.s32.totalorder %s1733_s19, %s1733_s19 }
  0x2e   : > { %p1736_p0 = pnand %p1734_p13, %p1672_p7 }
  0x2f   : > { %p1743_p9 = por %p1742_p8, %p1741_p4 }
  0x30   : > { %p1737_p2 = pneg %p1736_p0 }
  0x31   : > { %1562 = dma.hbm_to_vmem [thread:$0]  (!%p2006_p6), %s2315_s3, 256, %s305_s22, [#allocation13], %s1895_s26, %s1895_s26, %s1896_s27  }
  0x32   : > { %p1744_p10 = pnand %p1743_p9, %p1737_p2 }
  0x34   : > { %1747 = shalt.err (!%p1744_p10)
}
  0x35   : > { %s2316_s2 = sld [smem:[#allocation23_spill]]  ;;  %s1897_s22 = smov [#allocation14]  }
  0x36   : > { %s317_s29 = sshll.u32 %s1897_s22, 4  ;;  %s318_s29 = int_to_ptr.vmem [resolvable:$true] %s317_s29 }
  0x37   : > { %s1759_s18 = scalar_lea.vmem %s318_s29, 256  ;;  %p1767_p0 = scmp.lt.s32.totalorder %s318_s29, %s318_s29 }
  0x38   : > { %p1760_p11 = scmp.ne.s32.totalorder %s318_s29, %s1759_s18  ;;  %p1768_p2 = scmp.lt.s32.totalorder %s1759_s18, %s1759_s18 }
  0x3a   : > { %p1762_p12 = pnand %p1760_p11, %p1672_p7  ;;  %p1769_p4 = por %p1768_p2, %p1767_p0 }
  0x3b   : > { %1559 = dma.hbm_to_vmem [thread:$0]  (!%p2006_p6), %s2316_s2, 256, %s292_s24, [#allocation10], %s1895_s26, %s1895_s26, %s1896_s27  }
  0x3c   : > { %p1763_p13 = pneg %p1762_p12 }
  0x3e   : > { %p1770_p8 = pnand %p1769_p4, %p1763_p13 }
  0x40   : > { %1773 = shalt.err (!%p1770_p8)
}
  0x41   : > { %s2317_s4 = sld [smem:[#allocation25_spill]]  ;;  %s1371_s20 = sadd.s32 4294967294, %s1890_s14  }
  0x42   : > { %s39_s23 = sadd.s32 1, %s1886_s13  ;;  %s46_s19 = sadd.s32 1, %s1878_s11 }
  0x43   : > { %p41_p7 = scmp.ge.s32.totalorder %s39_s23, 2  ;;  %p53_p9 = scmp.ne.s32.totalorder %s1878_s11, %s1874_s10 }
  0x44   : > { %p54_p10 = scmp.eq.s32.totalorder %s1890_s14, 0  ;;  %p59_p12 = scmp.ne.s32.totalorder %s1874_s10, %s1870_s30 }
  0x45   : > { %s2332_s23 = smov (%p41_p7, %s39_s23), 0  ;;  %p259_p4 = scmp.eq.s32.totalorder %s1371_s20, 1 }
  0x46   : > { %2318 = sst [smem:[#allocation21_spill]] %s2332_s23  ;;  %p2064_p11 = por %p54_p10, %p53_p9 }
  0x47   : > { %1565 = dma.hbm_to_vmem [thread:$0]  (!%p2006_p6), %s2317_s4, 256, %s318_s29, [#allocation13], %s1895_s26, %s1895_s26, %s1896_s27  }
  0x48   : > { %s43_s26 = ssub.s32 %s1886_s13, %s2332_s23  ;;  %p253_p6 = scmp.eq.s32.totalorder %s1370_s15, 1 }
  0x49   : > { %p44_p13 = scmp.eq.s32.totalorder %s43_s26, 0  ;;  %p2076_p0 = por %p1992_p1, %p59_p12 }
  0x4a   : > { %p2080_p2 = por %p253_p6, %p53_p9  ;;  %p2087_p8 = por %p259_p4, %p59_p12 }
  0x4b   : > { %s2085_s22 = scalar_select %p44_p13, %s1878_s11, %s46_s19  }
  0x4c   : > { %s2322_s29 = scalar_select %p2087_p8, 1, 0 }
  0x4d   : > { %p1578_p7 = scmp.lt.s32.totalorder %s1890_s14, 2  ;;  %s343_s18 = sand.u32 1, %s1878_s11  }
  0x4e   : > { %s1379_s15 = sshll.u32 %s1886_s13, 6  ;;  %s1378_s24 = sshll.u32 %s343_s18, 2 }
  0x4f   : > { %s352_s1 = scalar_lea.hbm %s2294_s0, %s1379_s15  ;;  %s347_s2 = scalar_lea.vmem [#allocation6], %s1378_s24 }
  0x50   : > { %s354_s3 = sshll.u32 %s347_s2, 4  ;;  %p2099_p9 = pnand %p1578_p7, %p2064_p11  ;;  %s355_s3 = int_to_ptr.vmem [resolvable:$true] %s354_s3 }
  0x51   : > { %s344_s20 = scalar_lea.sflag [#allocation7], %s343_s18  ;;  %s1787_s19 = scalar_lea.vmem %s355_s3, 64 }
  0x52   : > { %p1776_p10 = pneg %p2099_p9  ;;  %p1788_p12 = scmp.ne.s32.totalorder %s355_s3, %s1787_s19 }
  0x53   : > { %s1898_s23 = smov [#allocation6]  }
  0x54   : > { %p1790_p6 = pnand %p1788_p12, %p1776_p10  ;;  %s1792_s13 = sshll.u32 %s1898_s23, 4  ;;  %s1793_s13 = int_to_ptr.vmem [resolvable:$false] %s1792_s13 }
  0x55   : > { %s1794_s15 = scalar_lea.vmem %s1793_s13, 128  ;;  %p1795_p4 = scmp.lt.s32.totalorder %s355_s3, %s1793_s13 }
  0x56   : > { %p1791_p13 = pneg %p1790_p6  ;;  %p1796_p5 = scmp.lt.s32.totalorder %s1794_s15, %s1787_s19 }
  0x58   : > { %p1797_p8 = por %p1796_p5, %p1795_p4 }
  0x5a   : > { %p1798_p11 = pnand %p1797_p8, %p1791_p13 }
  0x5c   : > { %1801 = shalt.err (!%p1798_p11)
}
  0x5d   : > { %1569 = dma.hbm_to_vmem [thread:$0]  (!%p2099_p9), %s352_s1, 64, %s355_s3, %s344_s20  }
  0x5e   : > { %363 = sbr.rel (%p1997_p3) target bundleno = 1674 (0x68a), region = 56  ;;  %s2110_s2 = sand.u32 (!%p1997_p3), 1, %s1874_s10  }
  0x5f   : > { %s1381_s23 = sshll.u32 (!%p1997_p3), %s2110_s2, 2  ;;  %s366_s25 = scalar_lea.sflag (!%p1997_p3), [#allocation7], %s2110_s2 }
  0x60   : > { %s369_s18 = scalar_lea.vmem (!%p1997_p3), [#allocation6], %s1381_s23 }
  0x63   : > { %1853 = dma.done.wait (%p2076_p0), %s366_s25, 64  }
  0x64   : > { %1855 = vsyncadd (%p2076_p0), %s366_s25, 4294967232 }
  0x65   : > { %1857 = dma.done.wait (%p1992_p1), [#allocation10], 512  }
  0x66   : > { %1859 = vsyncadd (%p1992_p1), [#allocation10], 4294966784 }
  0x67   : > { %1861 = dma.done.wait (%p1992_p1), [#allocation13], 512  }
  0x68   : > { %1863 = vsyncadd (%p1992_p1), [#allocation13], 4294966784  ;;  %v1899_v0 = vmov 0.0   ;;  %vm1900_vm0 = vmmov 0   ;;  %v1646_v1 = vld [vmem:[#allocation9 + $0x8] sm:$0xff]   ;;  %v1647_v2 = vld [vmem:[#allocation9] sm:$0xff]   ;;  %v889_v52 = vlaneseq }
  0x69   : > { %1461 = vmatprep.subr.bf16.mxu1 %v1899_v0  ;;  %1465 = vmatprep.mubr.msk.bf16.mxu1 %vm1900_vm0, %v1899_v0  ;;  %v1648_v3 = vld [vmem:[#allocation12 + $0x8] sm:$0xff]   ;;  %v425_v4 = vld [vmem:[%s369_s18] sm:$0xf]  ;;  %vm493_vm1 = vcmask 60416   ;;  %v1649_v5 = vld [vmem:[#allocation12] sm:$0xff]   ;;  %vm449_vm2 = vcmask 261120  }
  0x6a   : > { %1453 = vmatprep.subr.bf16.mxu0 %v1899_v0  ;;  %1457 = vmatprep.mubr.msk.bf16.mxu0 %vm1900_vm0, %v1899_v0  ;;  %494 = vst.msk [vmem:[#allocation2] sm:$0xf] %vm493_vm1, %v425_v4  ;;  %v536_v6 = vld [vmem:[%s369_s18] sm:$0xf]  ;;  %v1651_v9 = vld [vmem:[#allocation11] sm:$0xff]   ;;  %s1901_s1 = smov 120  }
  0x6b   : > { %1462 = vmatpush3.bf16.msra.mxu1 %v1646_v1  ;;  %1454 = vmatpush3.bf16.msra.mxu0 %v1648_v3  ;;  %v1650_v7 = vld [vmem:[#allocation11 + $0x8] sm:$0xff]   ;;  %v630_v10 = vsel %vm449_vm2, %v1651_v9, 0  ;;  %s1902_s3 = smov 112   ;;  %v1392_v11 = vld [vmem:[%s2299_s5] ss:$0 sm:$0xff]  ;;  %s1903_s27 = smov 104  }
  0x6c   : > { %1463 = vmatprep.subr.bf16.mxu1 %v1899_v0  ;;  %1455 = vmatprep.subr.bf16.mxu0 %v1899_v0  ;;  %v633_v8 = vsel %vm449_vm2, %v1650_v7, 0  ;;  %v1387_v14 = vld [vmem:[%s2301_s7] ss:$0 sm:$0xff]  ;;  %vm704_vm3 = vcmask 64512   ;;  %vm957_vm4 = vcmask 1043456   ;;  %v890_v53 = vshrl.u32 %v889_v52, 7 }
  0x6d   : > { %498 = vrot.lane.b32.xlu0 %v425_v4, %s1901_s1  ;;  %521 = vrot.lane.b32.xlu1 %v425_v4, %s1903_s27  ;;  %v1396_v32 = vld [vmem:[%s2300_s6] ss:$0 sm:$0xff]  ;;  %v894_v54 = vand.u32 127, %v889_v52  ;;  %s1904_s26 = smov 8   ;;  %s1905_s20 = smov 16   ;;  %vm1148_vm6 = vcmask 126016  }
  0x6e   : > { %s1906_s19 = smov 24   ;;  %vm1157_vm7 = vcmask 191616   ;;  %vm1166_vm8 = vcmask 257216   ;;  %s1386_s15 = sshll.u32 %s2110_s2, 3 }
  0x6f   : > { %1464 = vmatpush3.bf16.msra.mxu1 %v1647_v2  ;;  %1456 = vmatpush3.bf16.msra.mxu0 %v1649_v5  ;;  %vm895_vm5 = vcmp.le.s32.totalorder %v894_v54, %v890_v53  ;;  %s1417_s18 = sshll.u32 %s1882_s12, 7  ;;  %s1237_s17 = scalar_lea.sflag [#allocation8], %s2110_s2 }
  0x70   : > { %1477 = vmatprep.subr.bf16.mxu1 %v1899_v0  ;;  %1469 = vmatprep.subr.bf16.mxu0 %v1899_v0  ;;  %s2245_s16 = scalar_lea.hbm %s2303_s9, %s1417_s18 }
  0x71   : > { %511 = vrot.lane.b32.xlu0 %v425_v4, %s1902_s3  ;;  %v700_v25 = vld [vmem:[#allocation2] sm:$0xf] }
  0x72   : > { %1466 = vmatmul.mubr.msk.bf16.vlgmr.msra.gmra.mxu1 %vm449_vm2, %v536_v6  ;;  %1458 = vmatmul.mubr.msk.bf16.vlgmr.msra.gmra.mxu0 %vm449_vm2, %v425_v4  ;;  %v709_v26 = vsel %vm704_vm3, %v700_v25, 0 }
  0x73   : > { %1479 = vmatprep.mubr.msk.bf16.mxu1 %vm1900_vm0, %v1899_v0  ;;  %1470 = vmatpush3.bf16.xpose.msra.mxu0 %v633_v8 }
  0x74   : > { %1473 = vmatprep.mubr.msk.bf16.mxu0 %vm1900_vm0, %v1899_v0  ;;  %1471 = vmatprep.subr.bf16.mxu0 %v1899_v0 }
  0x75   : > { %1478 = vmatpush3.bf16.xpose.msra.mxu1 %v709_v26 }
  0x76   : > { %1483 = vmatprep.subr.bf16.mxu1 %v1899_v0 }
  0x7b   : > { %1472 = vmatpush3.bf16.xpose.msra.mxu0 %v630_v10 }
  0x7c   : > { %1489 = vmatprep.subr.bf16.mxu0 %v1899_v0 }
  0xdf   : > { %v499_v27 = vpop.permute.xlu0 %498  ;;  %v522_v29 = vpop.permute.xlu1 %521 }
  0xe0   : > { %502 = vst.msk [vmem:[#allocation2 + $0x4] sm:$0xf] %vm493_vm1, %v499_v27  ;;  %525 = vst.msk [vmem:[#allocation2 + $0xc] sm:$0xf] %vm493_vm1, %v522_v29 }
  0xe3   : > { %v512_v28 = vpop.permute.xlu0 %511 }
  0xe4   : > { %515 = vst.msk [vmem:[#allocation2 + $0x8] sm:$0xf] %vm493_vm1, %v512_v28 }
  0xe7   : > { %v701_v39 = vld [vmem:[#allocation2 + $0x4] sm:$0xf]  ;;  %v703_v45 = vld [vmem:[#allocation2 + $0xc] sm:$0xf] }
  0xe8   : > { %v755_v40 = vsel %vm704_vm3, %v701_v39, 0  ;;  %v847_v49 = vsel %vm704_vm3, %v703_v45, 0 }
  0xeb   : > { %v702_v30 = vld [vmem:[#allocation2 + $0x8] sm:$0xf] }
  0xec   : > { %v801_v31 = vsel %vm704_vm3, %v702_v30, 0 }
 0x132   : > { %v598_v12 = vpop.f32.mrf.mxu1  ;;  %v487_v17 = vpop.f32.mrf.mxu0 }
 0x133   : > { %v599_v13 = vadd.f32 %v1392_v11, %v598_v12  ;;  %v488_v19 = vadd.f32 %v1387_v14, %v487_v17 }
 0x134   : > { %v1467_v15 = vpop.f32.mrf.mxu1  ;;  %v1459_v20 = vpop.f32.mrf.mxu0 }
 0x135   : > { %v604_v16 = vpack.c.bf16 %v599_v13, %v599_v13  ;;  %v2156_v22 = vpack.c.bf16 %v488_v19, %v488_v19 }
 0x136   : > { %v601_v18 = vpop.f32.mrf.mxu1  ;;  %v490_v23 = vpop.f32.mrf.mxu0 }
 0x137   : > { %1474 = vmatmul.mubr.msk.bf16.vlgmr.msra.gmra.mxu0 %vm449_vm2, %v604_v16  ;;  %496 = vst.msk [vmem:[#allocation3] sm:$0xf] %vm493_vm1, %v2156_v22 }
 0x138   : > { %v1468_v21 = vpop.f32.mrf.mxu1  ;;  %1491 = vmatprep.mubr.msk.bf16.mxu0 %vm1900_vm0, %v1899_v0  ;;  %v1460_v24 = vpop.f32.mrf.mxu0  ;;  %1490 = vmatpush3.bf16.xpose.msra.mxu0 %v801_v31 }
 0x139   : > { %1501 = vmatprep.subr.bf16.mxu0 %v1899_v0 }
 0x13e   : > { %v950_v46 = vld [vmem:[#allocation3] sm:$0xf] }
 0x13f   : > { %v959_v50 = vsel %vm957_vm4, %v950_v46, 0 }
 0x1f7   : > { %v669_v33 = vpop.f32.mrf.mxu0 }
 0x1f8   : > { %v670_v34 = vadd.f32 %v1396_v32, %v669_v33 }
 0x1f9   : > { %v1475_v35 = vpop.f32.mrf.mxu0 }
 0x1fa   : > { %v675_v36 = vpack.c.bf16 %v670_v34, %v670_v34 }
 0x1fb   : > { %v672_v37 = vpop.f32.mrf.mxu0 }
 0x1fc   : > { %677 = vst.msk [vmem:[#allocation4] sm:$0xf] %vm493_vm1, %v675_v36  ;;  %686 = vrot.lane.b32.xlu0 %v675_v36, %s1902_s3  ;;  %681 = vrot.lane.b32.xlu1 %v675_v36, %s1901_s1 }
 0x1fd   : > { %v1476_v38 = vpop.f32.mrf.mxu0 }
 0x200   : > { %691 = vrot.lane.b32.xlu1 %v675_v36, %s1903_s27 }
 0x203   : > { %v696_v41 = vld [vmem:[#allocation4] sm:$0xf] }
 0x204   : > { %1480 = vmatmul.mubr.msk.bf16.vlgmr.msra.gmra.mxu1 %vm704_vm3, %v696_v41 }
 0x205   : > { %1484 = vmatpush3.bf16.xpose.msra.mxu1 %v755_v40  ;;  %1485 = vmatprep.mubr.msk.bf16.mxu1 %vm1900_vm0, %v1899_v0 }
 0x206   : > { %1495 = vmatprep.subr.bf16.mxu1 %v1899_v0 }
 0x26e   : > { %v687_v42 = vpop.permute.xlu0 %686  ;;  %v682_v43 = vpop.permute.xlu1 %681 }
 0x26f   : > { %690 = vst.msk [vmem:[#allocation4 + $0x8] sm:$0xf] %vm493_vm1, %v687_v42  ;;  %685 = vst.msk [vmem:[#allocation4 + $0x4] sm:$0xf] %vm493_vm1, %v682_v43 }
 0x272   : > { %v692_v44 = vpop.permute.xlu1 %691 }
 0x273   : > { %695 = vst.msk [vmem:[#allocation4 + $0xc] sm:$0xf] %vm493_vm1, %v692_v44 }
 0x276   : > { %v697_v47 = vld [vmem:[#allocation4 + $0x4] sm:$0xf]  ;;  %v698_v48 = vld [vmem:[#allocation4 + $0x8] sm:$0xf] }
 0x277   : > { %1486 = vmatmul.mubr.msk.bf16.vlgmr.msra.gmra.mxu1 %vm704_vm3, %v697_v47  ;;  %1492 = vmatmul.mubr.msk.bf16.vlgmr.msra.gmra.mxu0 %vm704_vm3, %v698_v48 }
 0x278   : > { %1496 = vmatpush3.bf16.xpose.msra.mxu1 %v847_v49  ;;  %1502 = vmatpush3.bf16.msra.mxu0 %v959_v50 }
 0x279   : > { %1497 = vmatprep.mubr.msk.bf16.mxu1 %vm1900_vm0, %v1899_v0  ;;  %1507 = vmatprep.subr.bf16.mxu1 %v1899_v0 }
 0x27a   : > { %1503 = vmatprep.mubr.msk.bf16.mxu0 %vm1900_vm0, %v1899_v0  ;;  %1513 = vmatprep.subr.bf16.mxu0 %v1899_v0  ;;  %v699_v51 = vld [vmem:[#allocation4 + $0xc] sm:$0xf] }
 0x27f   : > { %1498 = vmatmul.mubr.msk.bf16.vlgmr.msra.gmra.mxu1 %vm704_vm3, %v699_v51 }
 0x280   : > { %1509 = vmatprep.mubr.msk.bf16.mxu1 %vm1900_vm0, %v1899_v0 }
 0x2c4   : > { %v745_v55 = vpop.f32.mrf.mxu1 }
 0x2c5   : > { %v898_v56 = vsel %vm895_vm5, %v745_v55, -3.4028235e+38 }
 0x2c6   : > { %v1481_v57 = vpop.f32.mrf.mxu1  ;;  %v902_v58 = vsel %vm704_vm3, %v898_v56, -inf }
 0x2c7   : > { %903 = vmax.xlane.f32.xlu0 %v902_v58 }
 0x2c8   : > { %v748_v59 = vpop.f32.mrf.mxu1 }
 0x2ca   : > { %v1482_v60 = vpop.f32.mrf.mxu1 }
 0x337   : > { %v791_v61 = vpop.f32.mrf.mxu1  ;;  %v837_v62 = vpop.f32.mrf.mxu0 }
 0x338   : > { %v899_v63 = vsel %vm895_vm5, %v791_v61, -3.4028235e+38  ;;  %v900_v1 = vsel %vm895_vm5, %v837_v62, -3.4028235e+38 }
 0x339   : > { %v1487_v2 = vpop.f32.mrf.mxu1  ;;  %v1493_v3 = vpop.f32.mrf.mxu0  ;;  %v905_v4 = vsel %vm704_vm3, %v899_v63, -inf  ;;  %v908_v5 = vsel %vm704_vm3, %v900_v1, -inf }
 0x33a   : > { %906 = vmax.xlane.f32.xlu1 %v905_v4  ;;  %909 = vmax.xlane.f32.xlu0 %v908_v5  ;;  %v1652_v3 = vld [vmem:[#allocation14 + $0x8] sm:$0xff]   ;;  %v1653_v5 = vld [vmem:[#allocation14] sm:$0xff]  }
 0x33b   : > { %v794_v6 = vpop.f32.mrf.mxu1  ;;  %v840_v7 = vpop.f32.mrf.mxu0 }
 0x33d   : > { %v1488_v8 = vpop.f32.mrf.mxu1  ;;  %v1494_v9 = vpop.f32.mrf.mxu0 }
 0x33f   : > { %v883_v10 = vpop.f32.mrf.mxu1 }
 0x340   : > { %v901_v11 = vsel %vm895_vm5, %v883_v10, -3.4028235e+38 }
 0x341   : > { %v1499_v12 = vpop.f32.mrf.mxu1  ;;  %v911_v13 = vsel %vm704_vm3, %v901_v11, -inf }
 0x342   : > { %912 = vmax.xlane.f32.xlu0 %v911_v13 }
 0x343   : > { %v886_v14 = vpop.f32.mrf.mxu1 }
 0x345   : > { %v1500_v15 = vpop.f32.mrf.mxu1 }
 0x34b   : > { %506 = vrot.lane.b32.xlu1 %v2156_v22, %s1901_s1  ;;  %s419_s1 = scalar_lea.vmem [#allocation15], %s1386_s15 }
 0x350   : > { %v904_v16 = vpop.xlane.xlu0 %903 }
 0x351   : > { %v914_v17 = vsub.f32 %v898_v56, %v904_v16 }
 0x353   : > { %v918_v18 = vmul.f32 1.442695, %v914_v17 }
 0x355   : > { %1654 = vpow2.f32 %v918_v18 }
 0x362   : > { %v1655_v19 = vpop.eup %1654 }
 0x363   : > { %v926_v20 = vsel %vm704_vm3, %v1655_v19, 0.0 }
 0x36f   : > { %927 = vadd.xlane.f32.xlu1 %v926_v20 }
 0x3c3   : > { %v907_v21 = vpop.xlane.xlu1 %906  ;;  %v910_v23 = vpop.xlane.xlu0 %909 }
 0x3c4   : > { %v915_v24 = vsub.f32 %v899_v63, %v907_v21  ;;  %v916_v25 = vsub.f32 %v900_v1, %v910_v23 }
 0x3c6   : > { %v920_v26 = vmul.f32 1.442695, %v915_v24  ;;  %v922_v27 = vmul.f32 1.442695, %v916_v25  ;;  %v1412_v24 = vld [vmem:[%s2302_s8] ss:$0 sm:$0xff] }
 0x3c7   : > { %v507_v28 = vpop.permute.xlu1 %506 }
 0x3c8   : > { %1656 = vpow2.f32 %v920_v26  ;;  %510 = vst.msk [vmem:[#allocation3 + $0x4] sm:$0xf] %vm493_vm1, %v507_v28 }
 0x3c9   : > { %1658 = vpow2.f32 %v922_v27 }
 0x3cb   : > { %v913_v29 = vpop.xlane.xlu0 %912 }
 0x3cc   : > { %v917_v30 = vsub.f32 %v901_v11, %v913_v29 }
 0x3ce   : > { %v924_v31 = vmul.f32 1.442695, %v917_v30 }
 0x3cf   : > { %v951_v32 = vld [vmem:[#allocation3 + $0x4] sm:$0xf] }
 0x3d0   : > { %1660 = vpow2.f32 %v924_v31  ;;  %v1005_v33 = vsel %vm957_vm4, %v951_v32, 0 }
 0x3d1   : > { %1508 = vmatpush3.bf16.msra.mxu1 %v1005_v33 }
 0x3d2   : > { %1519 = vmatprep.subr.bf16.mxu1 %v1899_v0 }
 0x3d5   : > { %v1657_v34 = vpop.eup %1656 }
 0x3d6   : > { %v1659_v35 = vpop.eup %1658  ;;  %v929_v36 = vsel %vm704_vm3, %v1657_v34, 0.0 }
 0x3d7   : > { %930 = vadd.xlane.f32.xlu0 %v929_v36  ;;  %v932_v37 = vsel %vm704_vm3, %v1659_v35, 0.0 }
 0x3d8   : > { %933 = vadd.xlane.f32.xlu1 %v932_v37 }
 0x3dd   : > { %v1661_v38 = vpop.eup %1660 }
 0x3de   : > { %v935_v39 = vsel %vm704_vm3, %v1661_v38, 0.0 }
 0x3df   : > { %936 = vadd.xlane.f32.xlu0 %v935_v39 }
 0x3e9   : > { %526 = vrot.lane.b32.xlu1 %v2156_v22, %s1903_s27  ;;  %s1907_s27 = smov [#allocation15]  }
 0x3ea   : > { %s1806_s24 = sshll.u32 %s1907_s27, 4  ;;  %s1807_s24 = int_to_ptr.vmem [resolvable:$false] %s1806_s24 }
 0x3eb   : > { %s1808_s21 = scalar_lea.vmem %s1807_s24, 256 }
 0x3f5   : > { %516 = vrot.lane.b32.xlu0 %v2156_v22, %s1902_s3  ;;  %s1251_s3 = sshll.u32 %s419_s1, 4  ;;  %s2247_s3 = int_to_ptr.vmem [resolvable:$true] %s1251_s3 }
 0x3f6   : > { %s1802_s12 = scalar_lea.vmem %s2247_s3, 128  ;;  %p1809_p0 = scmp.lt.s32.totalorder %s2247_s3, %s1807_s24 }
 0x3f7   : > { %p1803_p1 = scmp.ne.s32.totalorder %s2247_s3, %s1802_s12  ;;  %p1810_p8 = scmp.lt.s32.totalorder %s1808_s21, %s1802_s12 }
 0x3f8   : > { %v928_v40 = vpop.xlane.xlu1 %927 }
 0x3f9   : > { %1662 = vrcp.f32 %v928_v40  ;;  %p1804_p3 = pnand %p1803_p1, %p2080_p2  ;;  %p1811_p7 = por %p1810_p8, %p1809_p0 }
 0x3fb   : > { %p1805_p5 = pneg %p1804_p3 }
 0x3fd   : > { %p1812_p9 = pnand %p1811_p7, %p1805_p5 }
 0x406   : > { %v1663_v41 = vpop.eup %1662 }
 0x407   : > { %v942_v42 = vmul.f32 %v1663_v41, %v1655_v19 }
 0x409   : > { %v946_v43 = vpack.c.bf16 %v942_v42, %v942_v42 }
 0x40b   : > { %1504 = vmatmul.mubr.msk.bf16.vlgmr.msra.gmra.mxu0 %vm704_vm3, %v946_v43 }
 0x40c   : > { %1515 = vmatprep.mubr.msk.bf16.mxu0 %vm1900_vm0, %v1899_v0 }
 0x460   : > { %v931_v44 = vpop.xlane.xlu0 %930 }
 0x461   : > { %v934_v45 = vpop.xlane.xlu1 %933  ;;  %1664 = vrcp.f32 %v931_v44 }
 0x462   : > { %1666 = vrcp.f32 %v934_v45 }
 0x465   : > { %v527_v46 = vpop.permute.xlu1 %526 }
 0x466   : > { %530 = vst.msk [vmem:[#allocation3 + $0xc] sm:$0xf] %vm493_vm1, %v527_v46 }
 0x468   : > { %v937_v47 = vpop.xlane.xlu0 %936 }
 0x469   : > { %1668 = vrcp.f32 %v937_v47 }
 0x46c   : > { %v517_v22 = vpop.permute.xlu0 %516 }
 0x46d   : > { %520 = vst.msk [vmem:[#allocation3 + $0x8] sm:$0xf] %vm493_vm1, %v517_v22  ;;  %v953_v51 = vld [vmem:[#allocation3 + $0xc] sm:$0xf] }
 0x46e   : > { %v1665_v48 = vpop.eup %1664  ;;  %v1097_v53 = vsel %vm957_vm4, %v953_v51, 0 }
 0x46f   : > { %v943_v49 = vmul.f32 %v1665_v48, %v1657_v34  ;;  %v1667_v50 = vpop.eup %1666 }
 0x470   : > { %v944_v54 = vmul.f32 %v1667_v50, %v1659_v35 }
 0x471   : > { %v947_v52 = vpack.c.bf16 %v943_v49, %v943_v49 }
 0x472   : > { %v948_v58 = vpack.c.bf16 %v944_v54, %v944_v54 }
 0x473   : > { %1510 = vmatmul.mubr.msk.bf16.vlgmr.msra.gmra.mxu1 %vm704_vm3, %v947_v52 }
 0x474   : > { %1520 = vmatpush3.bf16.msra.mxu1 %v1097_v53  ;;  %v952_v55 = vld [vmem:[#allocation3 + $0x8] sm:$0xf]  ;;  %1521 = vmatprep.mubr.msk.bf16.mxu1 %vm1900_vm0, %v1899_v0 }
 0x475   : > { %v1051_v56 = vsel %vm957_vm4, %v952_v55, 0 }
 0x476   : > { %v1669_v57 = vpop.eup %1668  ;;  %1514 = vmatpush3.bf16.msra.mxu0 %v1051_v56 }
 0x477   : > { %v945_v59 = vmul.f32 %v1669_v57, %v1661_v38  ;;  %1525 = vmatprep.subr.bf16.mxu0 %v1899_v0 }
 0x479   : > { %1516 = vmatmul.mubr.msk.bf16.vlgmr.msra.gmra.mxu0 %vm704_vm3, %v948_v58  ;;  %v949_v60 = vpack.c.bf16 %v945_v59, %v945_v59 }
 0x47a   : > { %1529 = vmatprep.mubr.msk.bf16.mxu0 %vm1900_vm0, %v1899_v0  ;;  %1526 = vmatpush3.bf16.msra.mxu0 %v1652_v3 }
 0x47b   : > { %1522 = vmatmul.mubr.msk.bf16.vlgmr.msra.gmra.mxu1 %vm704_vm3, %v949_v60  ;;  %1527 = vmatprep.subr.bf16.mxu0 %v1899_v0 }
 0x47e   : > { %1528 = vmatpush3.bf16.msra.mxu0 %v1653_v5 }
 0x4cb   : > { %v995_v61 = vpop.f32.mrf.mxu0 }
 0x4cc   : > { %v1139_v62 = vpack.c.bf16 %v995_v61, %v995_v61 }
 0x4cd   : > { %v1505_v63 = vpop.f32.mrf.mxu0 }
 0x4ce   : > { %1140 = vst.msk [vmem:[#allocation5] sm:$0xf] %vm493_vm1, %v1139_v62 }
 0x4cf   : > { %v998_v1 = vpop.f32.mrf.mxu0 }
 0x4d1   : > { %v1506_v2 = vpop.f32.mrf.mxu0 }
 0x533   : > { %v1041_v4 = vpop.f32.mrf.mxu1 }
 0x534   : > { %v1422_v6 = vpack.c.bf16 %v1041_v4, %v1041_v4 }
 0x535   : > { %v1511_v7 = vpop.f32.mrf.mxu1 }
 0x536   : > { %1145 = vrot.lane.b32.xlu1 %v1422_v6, %s1904_s26 }
 0x537   : > { %v1044_v8 = vpop.f32.mrf.mxu1 }
 0x539   : > { %v1512_v9 = vpop.f32.mrf.mxu1  ;;  %v1087_v10 = vpop.f32.mrf.mxu0 }
 0x53a   : > { %v1423_v11 = vpack.c.bf16 %v1087_v10, %v1087_v10 }
 0x53b   : > { %v1517_v12 = vpop.f32.mrf.mxu0  ;;  %v1133_v13 = vpop.f32.mrf.mxu1 }
 0x53c   : > { %v1424_v14 = vpack.c.bf16 %v1133_v13, %v1133_v13  ;;  %1154 = vrot.lane.b32.xlu0 %v1423_v11, %s1905_s20 }
 0x53d   : > { %v1090_v15 = vpop.f32.mrf.mxu0  ;;  %v1523_v16 = vpop.f32.mrf.mxu1 }
 0x53e   : > { %1163 = vrot.lane.b32.xlu1 %v1424_v14, %s1906_s19 }
 0x53f   : > { %v1518_v17 = vpop.f32.mrf.mxu0  ;;  %v1136_v0 = vpop.f32.mrf.mxu1 }
 0x541   : > { %v1524_v18 = vpop.f32.mrf.mxu1 }
 0x5a8   : > { %v1146_v19 = vpop.permute.xlu1 %1145 }
 0x5a9   : > { %1149 = vst.msk [vmem:[#allocation5] sm:$0xf] %vm1148_vm6, %v1146_v19 }
 0x5ae   : > { %v1155_v20 = vpop.permute.xlu0 %1154 }
 0x5af   : > { %1158 = vst.msk [vmem:[#allocation5] sm:$0xf] %vm1157_vm7, %v1155_v20 }
 0x5b0   : > { %v1164_v21 = vpop.permute.xlu1 %1163 }
 0x5b1   : > { %1167 = vst.msk [vmem:[#allocation5] sm:$0xf] %vm1166_vm8, %v1164_v21 }
 0x5b8   : > { %v1168_v23 = vld [vmem:[#allocation5] sm:$0xf] }
 0x5b9   : > { %1530 = vmatmul.mubr.msk.bf16.vlgmr.msra.gmra.mxu0 %vm449_vm2, %v1168_v23 }
 0x679   : > { %v1229_v25 = vpop.f32.mrf.mxu0 }
 0x67a   : > { %v1230_v26 = vadd.f32 %v1412_v24, %v1229_v25 }
 0x67b   : > { %v1531_v27 = vpop.f32.mrf.mxu0 }
 0x67c   : > { %1235 = vst.msk [vmem:[%s419_s1] sm:$0xff] %vm449_vm2, %v1230_v26 }
 0x67d   : > { %v1232_v28 = vpop.f32.mrf.mxu0 }
 0x67e   : > { %1815 = shalt.err (!%p1812_p9)
}
 0x67f   : > { %s1816_s26 = scalar_lea.hbm %s2245_s16, 128  ;;  %s1820_s19 = scalar_lea.hbm %s2303_s9, 256 }
 0x680   : > { %p1817_p10 = scmp.ne.s32.totalorder %s2245_s16, %s1816_s26  ;;  %p1821_p13 = scmp.lt.s32.totalorder %s2245_s16, %s2303_s9 }
 0x681   : > { %p1822_p4 = scmp.lt.s32.totalorder %s1820_s19, %s1816_s26 }
 0x682   : > { %p1818_p12 = pnand %p1817_p10, %p2080_p2 }
 0x683   : > { %p1823_p11 = por %p1822_p4, %p1821_p13 }
 0x684   : > { %p1819_p6 = pneg %p1818_p12 }
 0x686   : > { %p1824_p1 = pnand %p1823_p11, %p1819_p6 }
 0x688   : > { %1827 = shalt.err (!%p1824_p1)
}
 0x689   : > { %1551 = dma.vmem_to_hbm [thread:$0]  (%p2080_p2), %s2247_s3, 128, %s2245_s16, %s1237_s17   ;;  %v1532_v29 = vpop.f32.mrf.mxu0 }
 0x68a PF: > { %s1263_s25 = sand.u32 1, %s1870_s30   ;;  %p2324_p3 = scmp.ne.s32.totalorder %s2322_s29, 0 }
 0x68b   : > { %p2325_p5 = scmp.ge.s32.totalorder %s1890_s14, 2  ;;  %s1264_s18 = scalar_lea.sflag [#allocation8], %s1263_s25 }
 0x68d   : > { %p1571_p0 = pnand %p2325_p5, %p2324_p3 }
 0x68f   : > { %p1572_p8 = pneg %p1571_p0 }
 0x691   : > { %1865 = dma.done.wait (%p1572_p8), %s1264_s18, 128  }
 0x692   : > { %1867 = vsyncadd (%p1572_p8), %s1264_s18, 4294967168  ;;  %s27_s14 = sadd.s32 1, %s1890_s14   ;;  %s2326_s12 = sld [smem:[#allocation20_spill]] }
 0x693   : > { %p24_p7 = scmp.ge.s32.totalorder %s27_s14, 4   ;;  %s2327_s13 = sld [smem:[#allocation21_spill]] }
 0x694   : > { %s2328_s30 = smov %s1874_s10  ;;  %s2329_s10 = smov %s1878_s11 }
 0x695   : > { %s2330_s11 = smov %s2085_s22  ;;  %26 = sbr.rel (!%p24_p7) target bundleno = 13 (0xd), region = 131 }
 0x69a   :  { %1269 = vsyncpa [#allocation7], 1 }
 0x69b   :  { %1271 = vsyncpa [#allocation7 + $0x1], 1 }
 0x69c   :  { %1272 = vsyncpa [#allocation10], 1 }
 0x69d   :  { %1273 = vsyncpa [#allocation13], 1 }
 0x69e   :  { %1274 = vsyncpa [#allocation8], 1 }
 0x69f   :  { %1276 = vsyncpa [#allocation8 + $0x1], 1 }

</bundles_post_ra>
